<compile_context>
chip_gen: v7x
topology: tpu7x:2x2x1
jax: 0.10.0
libtpu: 0.0.40
codegen_flags: <defaults>
</compile_context>

<pallas_src>
import functools

import jax
import jax.numpy as jnp
from jax.experimental import pallas as pl
from jax.experimental.pallas import tpu as pltpu


def _round_up(x: int, m: int) -> int:
    return ((x + m - 1) // m) * m


def _pick_batch_tile(B: int, tb_max: int):
    """Choose (batch_tile, padded_batch) so the grid has >=2 steps when B>=16."""
    b8 = _round_up(B, 8)
    if b8 >= 16:
        # Cap the tile at half the batch so v7x's two TensorCores both get work
        # (weights are resident per-core anyway, so this costs no extra DMA).
        half = _round_up((b8 + 1) // 2, 8)
        tb_eff = min(tb_max, half)
    else:
        tb_eff = b8
    tb_eff = max(tb_eff, 8)
    b_pad = _round_up(b8, tb_eff)
    return tb_eff, b_pad


def _mlp_fused_kernel(*refs, n_layers: int, compute_dtype):
    # refs = (x_ref, w0_ref, b0_ref, ..., w{n-1}_ref, b{n-1}_ref, o_ref)
    x_ref = refs[0]
    o_ref = refs[-1]
    param_refs = refs[1:-1]

    h = x_ref[...].astype(compute_dtype)  # (TB, Din_pad) -> bf16 once
    for i in range(n_layers):
        w = param_refs[2 * i][...]        # (Din_pad_i, Dout_pad_i), bf16, pre-transposed
        b = param_refs[2 * i + 1][...]    # (1, Dout_pad_i), f32
        # bf16 x bf16 on the MXU, f32 accumulation.
        y = jax.lax.dot_general(
            h, w,
            dimension_numbers=(((1,), (0,)), ((), ())),
            preferred_element_type=jnp.float32,
        )
        y = y + b                         # f32 bias add (exact, applied once)
        if i < n_layers - 1:
            # f32 tanh on the EUP, then down-cast for the next MXU pass.
            h = jnp.tanh(y).astype(compute_dtype)
        else:
            h = y
    o_ref[...] = h.astype(o_ref.dtype)


def mlp_forward_pallas(x, params_padded, *, out_dim: int, tb: int = 256,
                       compute_dtype=jnp.bfloat16, out_dtype=None):
    """Fused MLP forward.

    x:             (B, Din) unpadded activations (any float dtype).
    params_padded: list of (w_pad, b_pad); w_pad (Din_pad, Dout_pad) bf16,
                   pre-transposed + zero-padded; b_pad (1, Dout_pad) f32.
    out_dim:       true (unpadded) final output feature count.
    """
    n_layers = len(params_padded)
    B, Din = x.shape
    din_pad = params_padded[0][0].shape[0]
    dout_pad_last = params_padded[-1][0].shape[1]
    out_dtype = x.dtype if out_dtype is None else out_dtype

    tb_eff, b_pad = _pick_batch_tile(B, tb)

    # Only materialize a padded copy of x when padding is actually required.
    if b_pad != B or din_pad != Din:
        x_p = jnp.zeros((b_pad, din_pad), dtype=x.dtype).at[:B, :Din].set(x)
    else:
        x_p = x

    grid = (b_pad // tb_eff,)

    in_specs = [pl.BlockSpec((tb_eff, din_pad), lambda i: (i, 0))]
    flat_params = []
    for (w, b) in params_padded:
        # Weights / biases: full-array blocks, constant index_map -> resident
        # in VMEM across all batch grid steps (no re-DMA).
        in_specs.append(pl.BlockSpec(w.shape, lambda i: (0, 0)))
        in_specs.append(pl.BlockSpec(b.shape, lambda i: (0, 0)))
        flat_params.append(w)
        flat_params.append(b)
    out_specs = pl.BlockSpec((tb_eff, dout_pad_last), lambda i: (i, 0))

    # --- explicit VMEM budget (weights counted double-buffered to be safe) ---
    weight_bytes = sum(int(a.size) * jnp.dtype(a.dtype).itemsize
                       for p in params_padded for a in p)
    act_in_bytes = 2 * tb_eff * din_pad * jnp.dtype(x.dtype).itemsize
    act_out_bytes = 2 * tb_eff * dout_pad_last * jnp.dtype(out_dtype).itemsize
    widest = max(max(w.shape[0], w.shape[1]) for w, _ in params_padded)
    inter_bytes = 2 * tb_eff * widest * 4  # f32 intermediate + bf16 copy slack
    need = 2 * weight_bytes + act_in_bytes + act_out_bytes + inter_bytes
    vmem_limit = int(min(max(int(need * 1.25) + (2 << 20), 32 << 20), 64 << 20))

    # --- advisory cost estimate for the XLA scheduler ---
    flops = 0
    trans = 0
    for li, (w, _) in enumerate(params_padded):
        flops += 2 * b_pad * w.shape[0] * w.shape[1]
        if li < n_layers - 1:
            trans += b_pad * w.shape[1]
    bytes_accessed = (weight_bytes
                      + int(x_p.size) * jnp.dtype(x_p.dtype).itemsize
                      + b_pad * dout_pad_last * jnp.dtype(out_dtype).itemsize)

    kernel = functools.partial(_mlp_fused_kernel, n_layers=n_layers,
                               compute_dtype=compute_dtype)

    out_p = pl.pallas_call(
        kernel,
        out_shape=jax.ShapeDtypeStruct((b_pad, dout_pad_last), out_dtype),
        grid=grid,
        in_specs=in_specs,
        out_specs=out_specs,
        compiler_params=pltpu.CompilerParams(
            dimension_semantics=("parallel",),
            vmem_limit_bytes=vmem_limit,
        ),
        cost_estimate=pl.CostEstimate(
            flops=int(flops),
            transcendentals=int(trans),
            bytes_accessed=int(bytes_accessed),
        ),
    )(x_p, *flat_params)

    # Strip batch / feature padding only when it exists.
    if b_pad != B or dout_pad_last != out_dim:
        out_p = out_p[:B, :out_dim]
    return out_p


class MLPPallas:
    """Pallas equivalent of the PyTorch MLP(sizes, bias=True, act=nn.Tanh)."""

    def __init__(self, sizes, key, dtype=jnp.float32, compute_dtype=jnp.bfloat16):
        self.sizes = tuple(sizes)

        # Generation-aware defaults (no failure if detection is inconclusive).
        kind = ""
        try:
            kind = jax.devices()[0].device_kind.lower()
        except Exception:
            pass
        is_v5e = ("v5 lite" in kind) or ("v5e" in kind) or ("v5lite" in kind)
        self._tb = 128 if is_v5e else 256      # v5e: 1 vst slot + small scoped VMEM
        mxu_mult = 128 if is_v5e else 256      # v6e/v7x MXU is 256 wide

        def _pad_dim(d):
            # Small dims pad to the 128-lane width; large dims to the MXU width.
            return _round_up(d, mxu_mult) if d >= mxu_mult else _round_up(d, 128)

        pads = [_pad_dim(s) for s in sizes]

        self.params = []          # PyTorch layout (Dout, Din) + (Dout,), f32, reference
        self.params_padded = []   # pre-transposed, padded, bf16 W / f32 b kernel params
        for i in range(len(sizes) - 1):
            key, kw, kb = jax.random.split(key, 3)
            fan_in = sizes[i]
            bound = 1.0 / (fan_in ** 0.5)
            # deterministic init mimicking nn.Linear's uniform(-1/sqrt(fan_in), +)
            w = jax.random.uniform(kw, (sizes[i + 1], sizes[i]),
                                   minval=-bound, maxval=bound, dtype=dtype)
            b = jax.random.uniform(kb, (sizes[i + 1],),
                                   minval=-bound, maxval=bound, dtype=dtype)
            self.params.append((w, b))
            # Pre-transpose to (Din, Dout), zero-pad both dims, store W in bf16
            # (MXU-native), bias in f32 (bias add stays exact).
            w_pad = jnp.zeros((pads[i], pads[i + 1]), dtype=compute_dtype)
            w_pad = w_pad.at[:sizes[i], :sizes[i + 1]].set(w.T.astype(compute_dtype))
            b_pad = jnp.zeros((1, pads[i + 1]), dtype=jnp.float32)
            b_pad = b_pad.at[0, :sizes[i + 1]].set(b.astype(jnp.float32))
            self.params_padded.append((w_pad, b_pad))

        self.n_layers = len(self.params)
        self.out_dim = self.sizes[-1]
        # jit once; out_dim / tile size / compute dtype are static.
        self._apply = jax.jit(functools.partial(
            mlp_forward_pallas, out_dim=self.out_dim, tb=self._tb,
            compute_dtype=compute_dtype))

    def __call__(self, x):
        return self._apply(x, self.params_padded)


if __name__ == "__main__":
    key = jax.random.PRNGKey(0)
    key, kx, kp = jax.random.split(key, 3)

    sizes = (32, 64, 48)   # small MLP: Linear(32->64), Tanh, Linear(64->48)
    batch = 16             # >=16 so the batch grid has 2 steps (megacore path)

    x = jax.random.normal(kx, (batch, sizes[0]), dtype=jnp.float32)

    mlp = MLPPallas(sizes, kp)
    out = jax.block_until_ready(mlp(x))

    # Reference in plain f32 JAX (PyTorch layout: y = x @ W.T + b).
    ref = x
    for i, (w, b) in enumerate(mlp.params):
        ref = ref @ w.T + b
        if i < mlp.n_layers - 1:
            ref = jnp.tanh(ref)

    assert out.shape == (batch, sizes[-1])
    assert out.dtype == x.dtype
    # bf16 MXU inputs with f32 accumulation -> relaxed tolerance vs the f32 ref.
    assert jnp.allclose(out, ref, atol=3e-2, rtol=3e-2)

    print("KERNEL_OK")
</pallas_src>

<mosaic_0001>
module attributes {stable_mosaic.version = 11 : i64} {
  func.func @_mlp_fused_kernel(%arg0: i32, %arg1: memref<8x128xf32, #tpu.memory_space<vmem>>, %arg2: memref<128x128xbf16, #tpu.memory_space<vmem>>, %arg3: memref<1x128xf32, #tpu.memory_space<vmem>>, %arg4: memref<128x128xbf16, #tpu.memory_space<vmem>>, %arg5: memref<1x128xf32, #tpu.memory_space<vmem>>, %arg6: memref<8x128xf32, #tpu.memory_space<vmem>>) attributes {dimension_semantics = [#tpu.dimension_semantics<parallel>], iteration_bounds = array<i64: 2>, scalar_prefetch = 0 : i64, scratch_operands = 0 : i64, tpu.core_type = #tpu.core_type<tc>, window_params = [{transform_indices = @transform_0, window_bounds = array<i64: 8, 128>}, {pipeline_mode = #tpu.pipeline_mode<synchronous>, transform_indices = @transform_1, window_bounds = array<i64: 128, 128>}, {pipeline_mode = #tpu.pipeline_mode<synchronous>, transform_indices = @transform_2, window_bounds = array<i64: 1, 128>}, {pipeline_mode = #tpu.pipeline_mode<synchronous>, transform_indices = @transform_3, window_bounds = array<i64: 128, 128>}, {pipeline_mode = #tpu.pipeline_mode<synchronous>, transform_indices = @transform_4, window_bounds = array<i64: 1, 128>}, {transform_indices = @transform_5, window_bounds = array<i64: 8, 128>}]} {
    %c0 = arith.constant 0 : index
    %c0_0 = arith.constant 0 : index
    %0 = vector.load %arg1[%c0, %c0_0] : memref<8x128xf32, #tpu.memory_space<vmem>>, vector<8x128xf32>
    %1 = arith.truncf %0 : vector<8x128xf32> to vector<8x128xbf16>
    %c0_1 = arith.constant 0 : index
    %c0_2 = arith.constant 0 : index
    %2 = vector.load %arg2[%c0_1, %c0_2] : memref<128x128xbf16, #tpu.memory_space<vmem>>, vector<128x128xbf16>
    %c0_3 = arith.constant 0 : index
    %c0_4 = arith.constant 0 : index
    %3 = vector.load %arg3[%c0_3, %c0_4] : memref<1x128xf32, #tpu.memory_space<vmem>>, vector<1x128xf32>
    %cst = arith.constant dense<0.000000e+00> : vector<8x128xf32>
    %4 = tpu.matmul %1, %2, %cst {dimension_numbers = #tpu.dot_dimension_numbers<[1], [0], [0], [1], [0, 0, 1, 1], [], []>} : vector<8x128xbf16>, vector<128x128xbf16>, vector<8x128xf32> -> vector<8x128xf32>
    %5 = vector.broadcast %3 : vector<1x128xf32> to vector<8x128xf32>
    %6 = arith.addf %4, %5 : vector<8x128xf32>
    %7 = math.tanh %6 : vector<8x128xf32>
    %8 = arith.truncf %7 : vector<8x128xf32> to vector<8x128xbf16>
    %c0_5 = arith.constant 0 : index
    %c0_6 = arith.constant 0 : index
    %9 = vector.load %arg4[%c0_5, %c0_6] : memref<128x128xbf16, #tpu.memory_space<vmem>>, vector<128x128xbf16>
    %c0_7 = arith.constant 0 : index
    %c0_8 = arith.constant 0 : index
    %10 = vector.load %arg5[%c0_7, %c0_8] : memref<1x128xf32, #tpu.memory_space<vmem>>, vector<1x128xf32>
    %cst_9 = arith.constant dense<0.000000e+00> : vector<8x128xf32>
    %11 = tpu.matmul %8, %9, %cst_9 {dimension_numbers = #tpu.dot_dimension_numbers<[1], [0], [0], [1], [0, 0, 1, 1], [], []>} : vector<8x128xbf16>, vector<128x128xbf16>, vector<8x128xf32> -> vector<8x128xf32>
    %12 = vector.broadcast %10 : vector<1x128xf32> to vector<8x128xf32>
    %13 = arith.addf %11, %12 : vector<8x128xf32>
    %c0_10 = arith.constant 0 : index
    %c0_11 = arith.constant 0 : index
    %14 = vector.load %arg6[%c0_10, %c0_11] : memref<8x128xf32, #tpu.memory_space<vmem>>, vector<8x128xf32>
    tpu.vector_store %arg6[%c0_10, %c0_11], %13 {strides = array<i32>} : memref<8x128xf32, #tpu.memory_space<vmem>>, vector<8x128xf32>,
    return
  }
  func.func @transform_0(%arg0: i32) -> (i32, i32) {
    %c0_i32 = arith.constant 0 : i32
    %c0_i32_0 = arith.constant 0 : i32
    return %arg0, %c0_i32 : i32, i32
  }
  func.func @transform_1(%arg0: i32) -> (i32, i32) {
    %c0_i32 = arith.constant 0 : i32
    %c0_i32_0 = arith.constant 0 : i32
    %c0_i32_1 = arith.constant 0 : i32
    return %c0_i32, %c0_i32_0 : i32, i32
  }
  func.func @transform_2(%arg0: i32) -> (i32, i32) {
    %c0_i32 = arith.constant 0 : i32
    %c0_i32_0 = arith.constant 0 : i32
    %c0_i32_1 = arith.constant 0 : i32
    return %c0_i32, %c0_i32_0 : i32, i32
  }
  func.func @transform_3(%arg0: i32) -> (i32, i32) {
    %c0_i32 = arith.constant 0 : i32
    %c0_i32_0 = arith.constant 0 : i32
    %c0_i32_1 = arith.constant 0 : i32
    return %c0_i32, %c0_i32_0 : i32, i32
  }
  func.func @transform_4(%arg0: i32) -> (i32, i32) {
    %c0_i32 = arith.constant 0 : i32
    %c0_i32_0 = arith.constant 0 : i32
    %c0_i32_1 = arith.constant 0 : i32
    return %c0_i32, %c0_i32_0 : i32, i32
  }
  func.func @transform_5(%arg0: i32) -> (i32, i32) {
    %c0_i32 = arith.constant 0 : i32
    %c0_i32_0 = arith.constant 0 : i32
    return %arg0, %c0_i32 : i32, i32
  }
}

</mosaic_0001>

<bundles_post_ra>
// kernel: mlp_forward_pallas.1
= control target key start
LH: loop header
LB: loop body
LE: loop exit
PB: predicated region body
PF: predicated region fallthrough
CT: control target
= control target key end

     0   :  { %10 = vsyncpa [#allocation3], 0  ;;  %s1005_s0 = inlined_call_operand.vmem [shape: f32[16,128], index: 0, kind: input, shape index: {}]   ;;  %s1006_s1 = inlined_call_operand.vmem [shape: bf16[128,128], index: 1, kind: input, shape index: {}]   ;;  %s1007_s2 = inlined_call_operand.vmem [shape: f32[1,128], index: 2, kind: input, shape index: {}]   ;;  %s1008_s3 = inlined_call_operand.hbm [shape: bf16[128,128], index: 3, kind: input, shape index: {}]   ;;  %s1009_s4 = inlined_call_operand.vmem [shape: f32[1,128], index: 4, kind: input, shape index: {}]   ;;  %s1010_s5 = inlined_call_operand.hbm [shape: f32[16,128], index: 5, kind: output, shape index: {}]  }
   0x1   :  { %11 = vsyncpa [#allocation4], 0 }
   0x2   :  { %13 = vsyncpa [#allocation4 + $0x1], 0  ;;  %s840_s18 = smov 0   ;;  %s842_s19 = smov 0  }
   0x3   :  { %s844_s20 = smov 0   ;;  %s846_s21 = smov 0  }
   0x4 LB: > { %s861_s22 = sadd.s32 4294967295, %s802_s21   ;;  %s548_s23 = sadd.s32 4294967294, %s802_s21   ;;  %s802_s21 = sphi %s846_s21, %s1026_s21   ;;  %s798_s20 = sphi %s844_s20, %s1025_s20   ;;  %s794_s19 = sphi %s842_s19, %s1024_s19   ;;  %s790_s18 = sphi %s840_s18, %s1023_s18  }
   0x5   : > { %s865_s24 = sadd.s32 1, %s802_s21   ;;  %s136_s25 = sadd.s32 1, %s798_s20 }
   0x6   : > { %s133_s26 = ssub.s32 %s802_s21, %s865_s24  ;;  %p146_p0 = scmp.ne.s32.totalorder %s798_s20, %s794_s19 }
   0x7   : > { %p134_p1 = scmp.eq.s32.totalorder %s133_s26, 0  ;;  %p147_p2 = scmp.eq.s32.totalorder %s861_s22, 1 }
   0x8   : > { %p152_p3 = scmp.ne.s32.totalorder %s794_s19, %s790_s18  ;;  %p153_p4 = scmp.eq.s32.totalorder %s548_s23, 1 }
   0x9   : > { %s876_s27 = scalar_select %p134_p1, %s798_s20, %s136_s25  }
   0xa   : > { %p878_p5 = por %p147_p2, %p146_p0  ;;  %p882_p6 = por %p153_p4, %p152_p3 }
   0xb   : > { %p549_p7 = scmp.ge.s32.totalorder %s802_s21, 1  ;;  %p160_p8 = scmp.lt.s32.totalorder %s802_s21, 3 }
   0xc   : > { %s1014_s28 = scalar_select %p878_p5, 1, 0 }
   0xd   : > { %s1015_s29 = scalar_select %p882_p6, 1, 0 }
   0xe   : > { %p1011_p9 = scmp.eq.s32.totalorder %s861_s22, 0  ;;  %p889_p10 = pnand %p549_p7, %p160_p8 }
   0xf   : > { %s804_s6 = smov [#allocation2]   ;;  %s708_s11 = scalar_lea.hbm %s1008_s3, 1024 }
  0x10   : > { %s1016_s30 = scalar_select %p889_p10, 1, 0 }
  0x11   : > { %s178_s7 = sshll.u32 %s804_s6, 4  ;;  %p642_p11 = pneg %p889_p10  ;;  %s179_s7 = int_to_ptr.vmem [resolvable:$true] %s178_s7 }
  0x12   : > { %p709_p13 = scmp.ne.s32.totalorder %s1008_s3, %s708_s11  ;;  %p715_p3 = scmp.lt.u32.totalorder %s708_s11, %s1008_s3 }
  0x13   : > { %p897_p12 = pnand %p1011_p9, %p642_p11 }
  0x15   : > { %p710_p0 = pneg %p897_p12 }
  0x17   : > { %p711_p1 = pnand %p710_p0, %p709_p13 }
  0x19   : > { %p712_p2 = pneg %p711_p1 }
  0x1b   : > { %p717_p4 = pnand %p715_p3, %p712_p2 }
  0x1d   : > { %720 = shalt.err (!%p717_p4)
}
  0x1e   : > { %s721_s16 = scalar_lea.vmem %s179_s7, 1024  ;;  %p729_p9 = scmp.lt.s32.totalorder %s179_s7, %s179_s7 }
  0x1f   : > { %p722_p7 = scmp.ne.s32.totalorder %s179_s7, %s721_s16  ;;  %p730_p6 = scmp.lt.s32.totalorder %s721_s16, %s721_s16 }
  0x21   : > { %p724_p8 = pnand %p722_p7, %p710_p0  ;;  %p731_p5 = por %p730_p6, %p729_p9 }
  0x23   : > { %p725_p11 = pneg %p724_p8 }
  0x25   : > { %p732_p10 = pnand %p731_p5, %p725_p11 }
  0x27   : > { %735 = shalt.err (!%p732_p10)
}
  0x28   : > { %s805_s17 = smov 64   ;;  %s806_s23 = smov 4  }
  0x29   : > { %645 = dma.hbm_to_vmem [thread:$0]  (!%p897_p12), %s1008_s3, 1024, %s179_s7, [#allocation3], %s805_s17, %s805_s17, %s806_s23  }
  0x2a   : > { %p1018_p13 = scmp.ne.s32.totalorder %s1016_s30, 0 }
  0x2b   : > { %p1019_p1 = scmp.eq.s32.totalorder (!%p1018_p13), %s861_s22, 0 }
  0x2c   : > { %204 = sbr.rel (%p1018_p13) target bundleno = 541 (0x21d), region = 40 }
  0x33   : > { %781 = dma.done.wait (%p1019_p1), [#allocation3], 1024   ;;  %p1020_p0 = pmov %p1019_p1 }
  0x34   : > { %v807_v0 = vmov 0.0   ;;  %vm808_vm0 = vmmov 0   ;;  %v690_v1 = vld [vmem:[%s1006_s1] sm:$0xff]   ;;  %v691_v2 = vld [vmem:[%s1006_s1 + $0x8] sm:$0xff]   ;;  %v692_v3 = vld [vmem:[%s1006_s1 + $0x10] sm:$0xff]   ;;  %p231_p5 = scmp.lt.s32.totalorder %s861_s22, 1 }
  0x35   : > { %783 = vsyncadd (%p1020_p0), [#allocation3], 4294966272  ;;  %596 = vmatprep.subr.bf16.mxu0 %v807_v0  ;;  %612 = vmatprep.mubr.msk.bf16.mxu0 %vm808_vm0, %v807_v0  ;;  %v698_v4 = vld [vmem:[#allocation2] sm:$0xff]   ;;  %v693_v5 = vld [vmem:[%s1006_s1 + $0x18] sm:$0xff]   ;;  %s228_s12 = sand.u32 1, %s794_s19   ;;  %s575_s16 = sshll.u32 %s861_s22, 7 }
  0x36   : > { %616 = vmatprep.subr.bf16.mxu1 %v807_v0  ;;  %632 = vmatprep.mubr.msk.bf16.mxu1 %vm808_vm0, %v807_v0  ;;  %v699_v6 = vld [vmem:[#allocation2 + $0x8] sm:$0xff]   ;;  %v694_v7 = vld [vmem:[%s1006_s1 + $0x20] sm:$0xff]   ;;  %v700_v8 = vld [vmem:[#allocation2 + $0x10] sm:$0xff]   ;;  %s232_s15 = scalar_select %p231_p5, %s861_s22, 1 }
  0x37   : > { %597 = vmatpush3.bf16.msra.mxu0 %v690_v1  ;;  %617 = vmatpush3.bf16.msra.mxu1 %v698_v4  ;;  %v695_v9 = vld [vmem:[%s1006_s1 + $0x28] sm:$0xff]   ;;  %v701_v10 = vld [vmem:[#allocation2 + $0x18] sm:$0xff]   ;;  %v696_v11 = vld [vmem:[%s1006_s1 + $0x30] sm:$0xff]   ;;  %s554_s13 = sshll.u32 %s228_s12, 3  ;;  %s963_s6 = scalar_lea.hbm %s1010_s5, %s575_s16 }
  0x38   : > { %598 = vmatprep.subr.bf16.mxu0 %v807_v0  ;;  %618 = vmatprep.subr.bf16.mxu1 %v807_v0  ;;  %s555_s23 = sshll.u32 %s232_s15, 3  ;;  %v697_v12 = vld [vmem:[%s1006_s1 + $0x38] sm:$0xff]   ;;  %v702_v15 = vld [vmem:[#allocation2 + $0x20] sm:$0xff]   ;;  %v703_v16 = vld [vmem:[#allocation2 + $0x28] sm:$0xff]   ;;  %s230_s17 = scalar_lea.vmem [#allocation5], %s554_s13 }
  0x39   : > { %s234_s30 = scalar_lea.vmem %s1005_s0, %s555_s23  ;;  %v704_v17 = vld [vmem:[#allocation2 + $0x30] sm:$0xff]   ;;  %v705_v18 = vld [vmem:[#allocation2 + $0x38] sm:$0xff]   ;;  %v556_v19 = vld [vmem:[%s1007_s2] ss:$0 sm:$0xff]  ;;  %s477_s23 = sshll.u32 %s230_s17, 4  ;;  %s965_s23 = int_to_ptr.vmem [resolvable:$true] %s477_s23 }
  0x3a   : > { %v236_v13 = vld [vmem:[%s234_s30] sm:$0xff]  ;;  %s464_s8 = scalar_lea.sflag [#allocation4], %s228_s12  ;;  %s736_s22 = scalar_lea.vmem %s965_s23, 128 }
  0x3b   : > { %599 = vmatpush3.bf16.msra.mxu0 %v691_v2  ;;  %619 = vmatpush3.bf16.msra.mxu1 %v699_v6  ;;  %v237_v14 = vpack.c.bf16 %v236_v13, %v236_v13  ;;  %v565_v27 = vld [vmem:[%s1009_s4] ss:$0 sm:$0xff]  ;;  %p737_p6 = scmp.ne.s32.totalorder %s965_s23, %s736_s22  ;;  %p1021_p9 = scmp.ne.s32.totalorder %s1014_s28, 0 }
  0x3c   : > { %600 = vmatprep.subr.bf16.mxu0 %v807_v0  ;;  %620 = vmatprep.subr.bf16.mxu1 %v807_v0  ;;  %s809_s30 = smov [#allocation5]  }
  0x3d   : > { %p738_p10 = pnand %p737_p6, %p1021_p9  ;;  %s740_s7 = sshll.u32 %s809_s30, 4  ;;  %s741_s7 = int_to_ptr.vmem [resolvable:$false] %s740_s7 }
  0x3e   : > { %s742_s9 = scalar_lea.vmem %s741_s7, 256  ;;  %p743_p2 = scmp.lt.s32.totalorder %s965_s23, %s741_s7 }
  0x3f   : > { %601 = vmatpush3.bf16.msra.mxu0 %v692_v3  ;;  %621 = vmatpush3.bf16.msra.mxu1 %v700_v8  ;;  %p739_p12 = pneg %p738_p10  ;;  %p744_p3 = scmp.lt.s32.totalorder %s742_s9, %s736_s22 }
  0x40   : > { %602 = vmatprep.subr.bf16.mxu0 %v807_v0  ;;  %622 = vmatprep.subr.bf16.mxu1 %v807_v0 }
  0x41   : > { %p745_p4 = por %p744_p3, %p743_p2 }
  0x43   : > { %603 = vmatpush3.bf16.msra.mxu0 %v693_v5  ;;  %623 = vmatpush3.bf16.msra.mxu1 %v701_v10  ;;  %p746_p7 = pnand %p745_p4, %p739_p12 }
  0x44   : > { %604 = vmatprep.subr.bf16.mxu0 %v807_v0  ;;  %624 = vmatprep.subr.bf16.mxu1 %v807_v0 }
  0x47   : > { %605 = vmatpush3.bf16.msra.mxu0 %v694_v7  ;;  %625 = vmatpush3.bf16.msra.mxu1 %v702_v15 }
  0x48   : > { %606 = vmatprep.subr.bf16.mxu0 %v807_v0  ;;  %626 = vmatprep.subr.bf16.mxu1 %v807_v0 }
  0x4b   : > { %607 = vmatpush3.bf16.msra.mxu0 %v695_v9  ;;  %627 = vmatpush3.bf16.msra.mxu1 %v703_v16 }
  0x4c   : > { %608 = vmatprep.subr.bf16.mxu0 %v807_v0  ;;  %628 = vmatprep.subr.bf16.mxu1 %v807_v0 }
  0x4f   : > { %609 = vmatpush3.bf16.msra.mxu0 %v696_v11  ;;  %629 = vmatpush3.bf16.msra.mxu1 %v704_v17 }
  0x50   : > { %610 = vmatprep.subr.bf16.mxu0 %v807_v0  ;;  %630 = vmatprep.subr.bf16.mxu1 %v807_v0 }
  0x53   : > { %611 = vmatpush3.bf16.msra.mxu0 %v697_v12  ;;  %631 = vmatpush3.bf16.msra.mxu1 %v705_v18 }
  0x56   : > { %613 = vmatmul.mubr.bf16.vlgmr.msra.gmra.mrb[0].mxu0 %v237_v14 }
 0x129   : > { %v343_v20 = vpop.f32.mrb[0].mxu0 }
 0x12a   : > { %v344_v21 = vadd.f32 %v556_v19, %v343_v20  ;;  %v614_v22 = vpop.f32.mrb[1].mxu0 }
 0x12b   : > { %v346_v23 = vpop.f32.mrb[2].mxu0 }
 0x12c   : > { %706 = vtanh.f32 %v344_v21  ;;  %v615_v24 = vpop.f32.mrb[3].mxu0 }
 0x136   : > { %v707_v25 = vpop.eup %706 }
 0x137   : > { %v350_v26 = vpack.c.bf16 %v707_v25, %v707_v25 }
 0x139   : > { %633 = vmatmul.mubr.bf16.vlgmr.msra.gmra.mrb[0].mxu1 %v350_v26 }
 0x20c   : > { %v456_v28 = vpop.f32.mrb[0].mxu1 }
 0x20d   : > { %v457_v29 = vadd.f32 %v565_v27, %v456_v28  ;;  %v634_v30 = vpop.f32.mrb[1].mxu1 }
 0x20e   : > { %v459_v31 = vpop.f32.mrb[2].mxu1 }
 0x20f   : > { %462 = vst [vmem:[%s230_s17] sm:$0xff] %v457_v29  ;;  %v635_v32 = vpop.f32.mrb[3].mxu1 }
 0x210   : > { %749 = shalt.err (!%p746_p7)
}
 0x211   : > { %s750_s10 = scalar_lea.hbm %s963_s6, 128  ;;  %s754_s13 = scalar_lea.hbm %s1010_s5, 256 }
 0x212   : > { %p751_p8 = scmp.ne.s32.totalorder %s963_s6, %s750_s10  ;;  %p755_p1 = scmp.lt.u32.totalorder %s963_s6, %s1010_s5 }
 0x213   : > { %p756_p0 = scmp.lt.u32.totalorder %s754_s13, %s750_s10  ;;  %p758_p6 = scmp.lt.u32.totalorder %s750_s10, %s963_s6 }
 0x214   : > { %p752_p11 = pnand %p751_p8, %p1021_p9 }
 0x215   : > { %p757_p5 = por %p756_p0, %p755_p1 }
 0x216   : > { %p753_p13 = pneg %p752_p11 }
 0x217   : > { %p759_p10 = por %p758_p6, %p757_p5 }
 0x219   : > { %p760_p12 = pnand %p759_p10, %p753_p13 }
 0x21b   : > { %763 = shalt.err (!%p760_p12)
}
 0x21c   : > { %640 = dma.vmem_to_hbm [thread:$0]  (%p1021_p9), %s965_s23, 128, %s963_s6, %s464_s8  }
 0x21d PF: > { %p652_p2 = scmp.ge.s32.totalorder %s802_s21, 2  ;;  %s489_s16 = sand.u32 1, %s790_s18  }
 0x21e   : > { %p1022_p3 = scmp.ne.s32.totalorder %s1015_s29, 0  ;;  %s490_s17 = scalar_lea.sflag [#allocation4], %s489_s16 }
 0x220   : > { %p647_p4 = pnand %p652_p2, %p1022_p3 }
 0x222   : > { %785 = dma.done.wait (!%p647_p4), %s490_s17, 128  }
 0x223   : > { %787 = vsyncadd (!%p647_p4), %s490_s17, 4294967168  ;;  %p16_p7 = scmp.ge.s32.totalorder %s865_s24, 4   ;;  %s1023_s18 = smov %s794_s19 }
 0x224   : > { %s1024_s19 = smov %s798_s20  ;;  %s1025_s20 = smov %s876_s27 }
 0x225   : > { %s1026_s21 = smov %s865_s24  ;;  %18 = sbr.rel (!%p16_p7) target bundleno = 4 (0x4), region = 80 }
 0x22c   :  { %495 = vsyncpa [#allocation3], 1 }
 0x22d   :  { %497 = vsyncpa [#allocation3 + $0x1], 1 }
 0x22e   :  { %498 = vsyncpa [#allocation4], 1 }
 0x22f   :  { %500 = vsyncpa [#allocation4 + $0x1], 1 }

</bundles_post_ra>
